<compile_context>
chip_gen: v6e
topology: v6e:2x2x1
jax: 0.10.0
libtpu: 0.0.40
codegen_flags: <defaults>
</compile_context>

<pallas_src>
import jax
import jax.numpy as jnp
from jax.experimental import pallas as pl
from jax.experimental.pallas import tpu as pltpu

INPUT_SIZE = 4
HIDDEN = 200
REP = 2

# Batch tile for the large-batch path: multiple of 8 (f32 sublane), sized well
# inside VMEM limits on v5e/v6e/v7x (padded blocks are tiny at these widths).
BATCH_TILE = 256


def vae_kernel(x_ref, wide_ref, w_post_ref, b_post_ref, w_de2_ref, b_de2_ref,
               recon_ref, post_ref):
    """Single-block VAE forward (eval mode).

    wide_ref rows: 0..3 = w_en1 (K=4), 4..5 = w_de1 (K=2), 6 = b_en1, 7 = b_de1.
    w_post_ref = [w_mu | w_std]  (HIDDEN, 2*REP); b_post_ref = [b_mu | b_std].
    post output columns: 0..REP-1 = mu, REP..2*REP-1 = logvar.
    """
    x = x_ref[...]                # [tb, INPUT_SIZE]
    wide = wide_ref[...]          # [8, HIDDEN]

    # Encoder layer 1: K=4 contraction as VPU broadcast-FMAs (keeps MXU free).
    h1 = (x[:, 0:1] * wide[0:1, :]
          + x[:, 1:2] * wide[1:2, :]
          + x[:, 2:3] * wide[2:3, :]
          + x[:, 3:4] * wide[3:4, :]
          + wide[6:7, :])
    h1 = jnp.maximum(h1, 0.0)

    # Fused posterior heads: a single K=HIDDEN MXU matmul produces [mu | logvar].
    post = (jnp.dot(h1, w_post_ref[...], preferred_element_type=jnp.float32)
            + b_post_ref[...])

    # Eval-mode reparameterisation: z = mu (columns 0..REP-1 of `post`).
    # TODO(synk): training-mode stochastic sampling (eps*std + mu) not implemented.
    # Decoder layer 1: K=2 contraction as VPU broadcast-FMAs.
    h2 = (post[:, 0:1] * wide[4:5, :]
          + post[:, 1:2] * wide[5:6, :]
          + wide[7:8, :])
    h2 = jnp.maximum(h2, 0.0)

    logits = (jnp.dot(h2, w_de2_ref[...], preferred_element_type=jnp.float32)
              + b_de2_ref[...])
    # sigmoid = 1 / (1 + exp(-x)): exp and reciprocal both run on the EUP slot.
    recon = pl.reciprocal(1.0 + jnp.exp(-logits), approx=False)

    recon_ref[...] = recon.astype(recon_ref.dtype)
    post_ref[...] = post.astype(post_ref.dtype)


@jax.jit
def vae_forward(x, packed):
    wide, w_post, b_post, w_de2, b_de2 = packed
    n = x.shape[0]
    out_dtype = jnp.float32

    if n <= BATCH_TILE:
        # Single shot: everything fits in VMEM -> no grid, no pipelining.
        recon, post = pl.pallas_call(
            vae_kernel,
            out_shape=(jax.ShapeDtypeStruct((n, INPUT_SIZE), out_dtype),
                       jax.ShapeDtypeStruct((n, 2 * REP), out_dtype)),
        )(x, wide, w_post, b_post, w_de2, b_de2)
    else:
        tb = BATCH_TILE
        n_blocks = pl.cdiv(n, tb)
        n_pad = n_blocks * tb
        if n_pad != n:
            x = jnp.pad(x, ((0, n_pad - n), (0, 0)))
        recon, post = pl.pallas_call(
            vae_kernel,
            grid=(n_blocks,),
            in_specs=[
                pl.BlockSpec((tb, INPUT_SIZE), lambda i: (i, 0)),   # x: batch-tiled
                pl.BlockSpec((8, HIDDEN), lambda i: (0, 0)),        # weights resident
                pl.BlockSpec((HIDDEN, 2 * REP), lambda i: (0, 0)),
                pl.BlockSpec((1, 2 * REP), lambda i: (0, 0)),
                pl.BlockSpec((HIDDEN, INPUT_SIZE), lambda i: (0, 0)),
                pl.BlockSpec((1, INPUT_SIZE), lambda i: (0, 0)),
            ],
            out_specs=(
                pl.BlockSpec((tb, INPUT_SIZE), lambda i: (i, 0)),
                pl.BlockSpec((tb, 2 * REP), lambda i: (i, 0)),
            ),
            out_shape=(jax.ShapeDtypeStruct((n_pad, INPUT_SIZE), out_dtype),
                       jax.ShapeDtypeStruct((n_pad, 2 * REP), out_dtype)),
            compiler_params=pltpu.CompilerParams(
                # Batch iterations are independent -> v7x shards across both TCs.
                dimension_semantics=("parallel",)),
        )(x, wide, w_post, b_post, w_de2, b_de2)
        recon = recon[:n]
        post = post[:n]

    mu = post[:, :REP]
    logvar = post[:, REP:]
    return recon, mu, logvar


def init_params(key):
    """Deterministic synthetic init. Weights stored as [in_features, out_features]."""
    def linear(key, fan_in, fan_out):
        kw, kb = jax.random.split(key)
        bound = 1.0 / jnp.sqrt(jnp.float32(fan_in))
        w = jax.random.uniform(kw, (fan_in, fan_out), jnp.float32, -bound, bound)
        b = jax.random.uniform(kb, (1, fan_out), jnp.float32, -bound, bound)
        return w, b

    keys = jax.random.split(key, 5)
    w_en1, b_en1 = linear(keys[0], INPUT_SIZE, HIDDEN)
    w_mu, b_mu = linear(keys[1], HIDDEN, REP)
    w_std, b_std = linear(keys[2], HIDDEN, REP)
    w_de1, b_de1 = linear(keys[3], REP, HIDDEN)
    w_de2, b_de2 = linear(keys[4], HIDDEN, INPUT_SIZE)
    return (w_en1, b_en1, w_mu, b_mu, w_std, b_std, w_de1, b_de1, w_de2, b_de2)


def pack_params(params):
    """One-time packing (outside the kernel): fewer, wider kernel inputs."""
    (w_en1, b_en1, w_mu, b_mu, w_std, b_std, w_de1, b_de1, w_de2, b_de2) = params
    wide = jnp.concatenate([w_en1, w_de1, b_en1, b_de1], axis=0)   # [8, HIDDEN]
    w_post = jnp.concatenate([w_mu, w_std], axis=1)                # [HIDDEN, 2*REP]
    b_post = jnp.concatenate([b_mu, b_std], axis=1)                # [1, 2*REP]
    return (wide, w_post, b_post, w_de2, b_de2)


def vae_forward_spec_ref(x, params):
    """Direct transcription of the PyTorch forward (eval mode)."""
    (w_en1, b_en1, w_mu, b_mu, w_std, b_std, w_de1, b_de1, w_de2, b_de2) = params
    h1 = jnp.maximum(x @ w_en1 + b_en1, 0.0)
    mu = h1 @ w_mu + b_mu
    logvar = h1 @ w_std + b_std
    z = mu
    h2 = jnp.maximum(z @ w_de1 + b_de1, 0.0)
    recon = jax.nn.sigmoid(h2 @ w_de2 + b_de2)
    return recon, mu, logvar


def vae_forward_packed_ref(x, packed):
    """Same math as the kernel (fused/packed operands) in plain jnp; used for the
    tight numerical check (XLA:TPU default f32 matmul precision makes the
    spec-form reference only loosely comparable to the exact VPU FMAs)."""
    wide, w_post, b_post, w_de2, b_de2 = packed
    h1 = (x[:, 0:1] * wide[0:1] + x[:, 1:2] * wide[1:2]
          + x[:, 2:3] * wide[2:3] + x[:, 3:4] * wide[3:4] + wide[6:7])
    h1 = jnp.maximum(h1, 0.0)
    post = h1 @ w_post + b_post
    h2 = post[:, 0:1] * wide[4:5] + post[:, 1:2] * wide[5:6] + wide[7:8]
    h2 = jnp.maximum(h2, 0.0)
    recon = jax.nn.sigmoid(h2 @ w_de2 + b_de2)
    return recon, post[:, :REP], post[:, REP:]


if __name__ == "__main__":
    key = jax.random.PRNGKey(0)
    k_param, k_x1, k_x2 = jax.random.split(key, 3)
    params = init_params(k_param)
    packed = pack_params(params)

    def make_batch(k, n):
        labels = jnp.arange(n) % INPUT_SIZE
        xb = jax.nn.one_hot(labels, INPUT_SIZE, dtype=jnp.float32)
        # small deterministic noise so the sigmoid output is not trivially symmetric
        return xb + 0.01 * jax.random.uniform(k, xb.shape, jnp.float32)

    def check(xb):
        recon, mu, logvar = vae_forward(xb, packed)
        jax.block_until_ready((recon, mu, logvar))

        # Tight check vs a jnp mirror of the kernel math.
        recon_m, mu_m, logvar_m = vae_forward_packed_ref(xb, packed)
        assert jnp.allclose(recon, recon_m, atol=1e-5), "recon mismatch (packed ref)"
        assert jnp.allclose(mu, mu_m, atol=1e-5), "mu mismatch (packed ref)"
        assert jnp.allclose(logvar, logvar_m, atol=1e-5), "logvar mismatch (packed ref)"

        # Sanity check vs the direct PyTorch-style formulation (loose tolerance:
        # XLA's default reduced-precision f32 matmul on TPU vs exact VPU FMAs).
        recon_s, mu_s, logvar_s = vae_forward_spec_ref(xb, params)
        assert jnp.allclose(recon, recon_s, atol=5e-2), "recon mismatch (spec ref)"
        assert jnp.allclose(mu, mu_s, atol=5e-2), "mu mismatch (spec ref)"
        assert jnp.allclose(logvar, logvar_s, atol=5e-2), "logvar mismatch (spec ref)"

    # Small batch -> grid-less, fully-resident path.
    check(make_batch(k_x1, 8))
    # Larger batch (not a multiple of the tile) -> batch-tiled, parallel-grid path.
    check(make_batch(k_x2, 300))

    print("KERNEL_OK")
</pallas_src>

<mosaic_0001>
module attributes {stable_mosaic.version = 11 : i64} {
  func.func @vae_kernel(%arg0: memref<8x4xf32, #tpu.memory_space<vmem>>, %arg1: memref<8x200xf32, #tpu.memory_space<vmem>>, %arg2: memref<200x4xf32, #tpu.memory_space<vmem>>, %arg3: memref<1x4xf32, #tpu.memory_space<vmem>>, %arg4: memref<200x4xf32, #tpu.memory_space<vmem>>, %arg5: memref<1x4xf32, #tpu.memory_space<vmem>>, %arg6: memref<8x4xf32, #tpu.memory_space<vmem>>, %arg7: memref<8x4xf32, #tpu.memory_space<vmem>>) attributes {dimension_semantics = [], scalar_prefetch = 0 : i64, scratch_operands = 0 : i64, tpu.core_type = #tpu.core_type<tc>} {
    %c0 = arith.constant 0 : index
    %c0_0 = arith.constant 0 : index
    %0 = vector.load %arg0[%c0, %c0_0] : memref<8x4xf32, #tpu.memory_space<vmem>>, vector<8x4xf32>
    %c0_1 = arith.constant 0 : index
    %c0_2 = arith.constant 0 : index
    %1 = vector.load %arg1[%c0_1, %c0_2] : memref<8x200xf32, #tpu.memory_space<vmem>>, vector<8x200xf32>
    %2 = vector.extract_strided_slice %0 {offsets = [0, 0], sizes = [8, 1], strides = [1, 1]} : vector<8x4xf32> to vector<8x1xf32>
    %3 = vector.extract_strided_slice %1 {offsets = [0, 0], sizes = [1, 200], strides = [1, 1]} : vector<8x200xf32> to vector<1x200xf32>
    %4 = vector.broadcast %2 : vector<8x1xf32> to vector<8x200xf32>
    %5 = vector.broadcast %3 : vector<1x200xf32> to vector<8x200xf32>
    %6 = arith.mulf %4, %5 : vector<8x200xf32>
    %7 = vector.extract_strided_slice %0 {offsets = [0, 1], sizes = [8, 1], strides = [1, 1]} : vector<8x4xf32> to vector<8x1xf32>
    %8 = vector.extract_strided_slice %1 {offsets = [1, 0], sizes = [1, 200], strides = [1, 1]} : vector<8x200xf32> to vector<1x200xf32>
    %9 = vector.broadcast %7 : vector<8x1xf32> to vector<8x200xf32>
    %10 = vector.broadcast %8 : vector<1x200xf32> to vector<8x200xf32>
    %11 = arith.mulf %9, %10 : vector<8x200xf32>
    %12 = arith.addf %6, %11 : vector<8x200xf32>
    %13 = vector.extract_strided_slice %0 {offsets = [0, 2], sizes = [8, 1], strides = [1, 1]} : vector<8x4xf32> to vector<8x1xf32>
    %14 = vector.extract_strided_slice %1 {offsets = [2, 0], sizes = [1, 200], strides = [1, 1]} : vector<8x200xf32> to vector<1x200xf32>
    %15 = vector.broadcast %13 : vector<8x1xf32> to vector<8x200xf32>
    %16 = vector.broadcast %14 : vector<1x200xf32> to vector<8x200xf32>
    %17 = arith.mulf %15, %16 : vector<8x200xf32>
    %18 = arith.addf %12, %17 : vector<8x200xf32>
    %19 = vector.extract_strided_slice %0 {offsets = [0, 3], sizes = [8, 1], strides = [1, 1]} : vector<8x4xf32> to vector<8x1xf32>
    %20 = vector.extract_strided_slice %1 {offsets = [3, 0], sizes = [1, 200], strides = [1, 1]} : vector<8x200xf32> to vector<1x200xf32>
    %21 = vector.broadcast %19 : vector<8x1xf32> to vector<8x200xf32>
    %22 = vector.broadcast %20 : vector<1x200xf32> to vector<8x200xf32>
    %23 = arith.mulf %21, %22 : vector<8x200xf32>
    %24 = arith.addf %18, %23 : vector<8x200xf32>
    %25 = vector.extract_strided_slice %1 {offsets = [6, 0], sizes = [1, 200], strides = [1, 1]} : vector<8x200xf32> to vector<1x200xf32>
    %26 = vector.broadcast %25 : vector<1x200xf32> to vector<8x200xf32>
    %27 = arith.addf %24, %26 : vector<8x200xf32>
    %cst = arith.constant 0.000000e+00 : f32
    %28 = vector.broadcast %cst : f32 to vector<8x200xf32>
    %29 = arith.maximumf %27, %28 : vector<8x200xf32>
    %c0_3 = arith.constant 0 : index
    %c0_4 = arith.constant 0 : index
    %30 = vector.load %arg2[%c0_3, %c0_4] : memref<200x4xf32, #tpu.memory_space<vmem>>, vector<200x4xf32>
    %cst_5 = arith.constant dense<0.000000e+00> : vector<8x4xf32>
    %31 = tpu.matmul %29, %30, %cst_5 {dimension_numbers = #tpu.dot_dimension_numbers<[1], [0], [0], [1], [0, 0, 1, 1], [], []>} : vector<8x200xf32>, vector<200x4xf32>, vector<8x4xf32> -> vector<8x4xf32>
    %c0_6 = arith.constant 0 : index
    %c0_7 = arith.constant 0 : index
    %32 = vector.load %arg3[%c0_6, %c0_7] : memref<1x4xf32, #tpu.memory_space<vmem>>, vector<1x4xf32>
    %33 = vector.broadcast %32 : vector<1x4xf32> to vector<8x4xf32>
    %34 = arith.addf %31, %33 : vector<8x4xf32>
    %35 = vector.extract_strided_slice %34 {offsets = [0, 0], sizes = [8, 1], strides = [1, 1]} : vector<8x4xf32> to vector<8x1xf32>
    %36 = vector.extract_strided_slice %1 {offsets = [4, 0], sizes = [1, 200], strides = [1, 1]} : vector<8x200xf32> to vector<1x200xf32>
    %37 = vector.broadcast %35 : vector<8x1xf32> to vector<8x200xf32>
    %38 = vector.broadcast %36 : vector<1x200xf32> to vector<8x200xf32>
    %39 = arith.mulf %37, %38 : vector<8x200xf32>
    %40 = vector.extract_strided_slice %34 {offsets = [0, 1], sizes = [8, 1], strides = [1, 1]} : vector<8x4xf32> to vector<8x1xf32>
    %41 = vector.extract_strided_slice %1 {offsets = [5, 0], sizes = [1, 200], strides = [1, 1]} : vector<8x200xf32> to vector<1x200xf32>
    %42 = vector.broadcast %40 : vector<8x1xf32> to vector<8x200xf32>
    %43 = vector.broadcast %41 : vector<1x200xf32> to vector<8x200xf32>
    %44 = arith.mulf %42, %43 : vector<8x200xf32>
    %45 = arith.addf %39, %44 : vector<8x200xf32>
    %46 = vector.extract_strided_slice %1 {offsets = [7, 0], sizes = [1, 200], strides = [1, 1]} : vector<8x200xf32> to vector<1x200xf32>
    %47 = vector.broadcast %46 : vector<1x200xf32> to vector<8x200xf32>
    %48 = arith.addf %45, %47 : vector<8x200xf32>
    %cst_8 = arith.constant 0.000000e+00 : f32
    %49 = vector.broadcast %cst_8 : f32 to vector<8x200xf32>
    %50 = arith.maximumf %48, %49 : vector<8x200xf32>
    %c0_9 = arith.constant 0 : index
    %c0_10 = arith.constant 0 : index
    %51 = vector.load %arg4[%c0_9, %c0_10] : memref<200x4xf32, #tpu.memory_space<vmem>>, vector<200x4xf32>
    %cst_11 = arith.constant dense<0.000000e+00> : vector<8x4xf32>
    %52 = tpu.matmul %50, %51, %cst_11 {dimension_numbers = #tpu.dot_dimension_numbers<[1], [0], [0], [1], [0, 0, 1, 1], [], []>} : vector<8x200xf32>, vector<200x4xf32>, vector<8x4xf32> -> vector<8x4xf32>
    %c0_12 = arith.constant 0 : index
    %c0_13 = arith.constant 0 : index
    %53 = vector.load %arg5[%c0_12, %c0_13] : memref<1x4xf32, #tpu.memory_space<vmem>>, vector<1x4xf32>
    %54 = vector.broadcast %53 : vector<1x4xf32> to vector<8x4xf32>
    %55 = arith.addf %52, %54 : vector<8x4xf32>
    %cst_14 = arith.constant 0.000000e+00 : f32
    %56 = vector.broadcast %cst_14 : f32 to vector<8x4xf32>
    %57 = arith.subf %56, %55 : vector<8x4xf32>
    %58 = math.exp %57 : vector<8x4xf32>
    %cst_15 = arith.constant 1.000000e+00 : f32
    %59 = vector.broadcast %cst_15 : f32 to vector<8x4xf32>
    %60 = arith.addf %59, %58 : vector<8x4xf32>
    %61 = tpu.reciprocal %60 : vector<8x4xf32> -> vector<8x4xf32>
    %c0_16 = arith.constant 0 : index
    %c0_17 = arith.constant 0 : index
    %62 = vector.load %arg6[%c0_16, %c0_17] : memref<8x4xf32, #tpu.memory_space<vmem>>, vector<8x4xf32>
    tpu.vector_store %arg6[%c0_16, %c0_17], %61 {strides = array<i32>} : memref<8x4xf32, #tpu.memory_space<vmem>>, vector<8x4xf32>,
    %c0_18 = arith.constant 0 : index
    %c0_19 = arith.constant 0 : index
    %63 = vector.load %arg7[%c0_18, %c0_19] : memref<8x4xf32, #tpu.memory_space<vmem>>, vector<8x4xf32>
    tpu.vector_store %arg7[%c0_18, %c0_19], %34 {strides = array<i32>} : memref<8x4xf32, #tpu.memory_space<vmem>>, vector<8x4xf32>,
    return
  }
}

</mosaic_0001>

<bundles_post_ra>
// kernel: vae_forward.1
= control target key start
LH: loop header
LB: loop body
LE: loop exit
PB: predicated region body
PF: predicated region fallthrough
CT: control target
= control target key end

     0   :  { %v391_v0 = vmov 0   ;;  %v392_v2 = vmov 2   ;;  %v393_v4 = vmov 0.0   ;;  %v394_v6 = vmov 1   ;;  %s691_s0 = inlined_call_operand.vmem [shape: f32[8,4], index: 0, kind: input, shape index: {}]   ;;  %s692_s2 = inlined_call_operand.vmem [shape: f32[200,4], index: 2, kind: input, shape index: {}]   ;;  %s693_s1 = inlined_call_operand.vmem [shape: f32[8,200], index: 1, kind: input, shape index: {}]   ;;  %s694_s4 = inlined_call_operand.vmem [shape: f32[200,4], index: 4, kind: input, shape index: {}]   ;;  %s695_s3 = inlined_call_operand.vmem [shape: f32[1,4], index: 3, kind: input, shape index: {}]   ;;  %s696_s7 = inlined_call_operand.vmem [shape: f32[8,4], index: 7, kind: output, shape index: {1}]   ;;  %s697_s5 = inlined_call_operand.vmem [shape: f32[1,4], index: 5, kind: input, shape index: {}]   ;;  %s698_s6 = inlined_call_operand.vmem [shape: f32[8,4], index: 6, kind: output, shape index: {0}]  }
   0x1   :  { %382 = vset.pattern.permute.xlu0 %v391_v0  ;;  %v25_v1 = vld [vmem:[%s691_s0] sm:$0xff]  ;;  %384 = vset.pattern.permute.xlu1 %v392_v2  ;;  %v118_v3 = vld [vmem:[%s692_s2 + $0x78] sm:$0xff]  ;;  %v117_v5 = vld [vmem:[%s692_s2 + $0x70] sm:$0xff]  ;;  %v395_v7 = vmov 3   ;;  %v33_v31 = vlaneseq  ;;  %vm135_vm0 = vcmask 588800   ;;  %vm362_vm1 = vcmask 31744  }
   0x2   :  { %30 = vperm.xlu0 %382, %v25_v1   ;;  %60 = vperm.xlu1 %384, %v25_v1   ;;  %v116_v8 = vld [vmem:[%s692_s2 + $0x68] sm:$0xff]  ;;  %v115_v9 = vld [vmem:[%s692_s2 + $0x60] sm:$0xff]  ;;  %v114_v10 = vld [vmem:[%s692_s2 + $0x58] sm:$0xff] }
   0x3   :  { %139 = vmatprep.subr.mxu0 %v393_v4  ;;  %287 = vmatprep.subr.mxu1 %v393_v4  ;;  %v113_v11 = vld [vmem:[%s692_s2 + $0x50] sm:$0xff]  ;;  %v112_v12 = vld [vmem:[%s692_s2 + $0x48] sm:$0xff]  ;;  %v111_v13 = vld [vmem:[%s692_s2 + $0x40] sm:$0xff]  ;;  %v540_v32 = vshrl.u32 %v33_v31, 7 }
   0x4   :  { %140 = vmatpush1.msra.mxu0 %v118_v3  ;;  %v110_v14 = vld [vmem:[%s692_s2 + $0x38] sm:$0xff]  ;;  %v109_v15 = vld [vmem:[%s692_s2 + $0x30] sm:$0xff]  ;;  %v108_v16 = vld [vmem:[%s692_s2 + $0x28] sm:$0xff] }
   0x5   :  { %141 = vmatprep.subr.mxu0 %v393_v4  ;;  %v107_v17 = vld [vmem:[%s692_s2 + $0x20] sm:$0xff]  ;;  %v106_v18 = vld [vmem:[%s692_s2 + $0x18] sm:$0xff]  ;;  %v105_v19 = vld [vmem:[%s692_s2 + $0x10] sm:$0xff]  ;;  %v35_v33 = vsub.s32 0, %v540_v32  ;;  %v49_v34 = vsub.s32 1, %v540_v32  ;;  %v65_v37 = vsub.s32 2, %v540_v32 }
   0x6   :  { %383 = vset.pattern.permute.xlu0 %v394_v6  ;;  %385 = vset.pattern.permute.xlu1 %v395_v7  ;;  %v104_v20 = vld [vmem:[%s692_s2 + $0x8] sm:$0xff]  ;;  %v103_v21 = vld [vmem:[%s692_s2] sm:$0xff]  ;;  %v126_v23 = vld [vmem:[%s692_s2 + $0xb8] sm:$0xff]  ;;  %v81_v40 = vsub.s32 3, %v540_v32  ;;  %v93_v51 = vsub.s32 6, %v540_v32 }
   0x7   :  { %44 = vperm.xlu0 %383, %v25_v1   ;;  %76 = vperm.xlu1 %385, %v25_v1   ;;  %v127_v22 = vld [vmem:[%s692_s2 + $0xc0] sm:$0xff]  ;;  %v125_v24 = vld [vmem:[%s692_s2 + $0xb0] sm:$0xff]  ;;  %v124_v25 = vld [vmem:[%s692_s2 + $0xa8] sm:$0xff] }
   0x8   :  { %142 = vmatpush1.msra.mxu0 %v117_v5  ;;  %v123_v26 = vld [vmem:[%s692_s2 + $0xa0] sm:$0xff]  ;;  %v122_v27 = vld [vmem:[%s692_s2 + $0x98] sm:$0xff]  ;;  %v121_v28 = vld [vmem:[%s692_s2 + $0x90] sm:$0xff] }
   0x9   :  { %143 = vmatprep.subr.mxu0 %v393_v4  ;;  %v120_v29 = vld [vmem:[%s692_s2 + $0x88] sm:$0xff]  ;;  %v119_v30 = vld [vmem:[%s692_s2 + $0x80] sm:$0xff] }
   0xa   :  { %144 = vmatpush1.msra.mxu0 %v116_v8  ;;  %v547_v35 = vld [vmem:[%s693_s1] sm:$0xff]  ;;  %v552_v36 = vld [vmem:[%s693_s1 + $0x8] sm:$0xff] }
   0xb   :  { %145 = vmatprep.subr.mxu0 %v393_v4  ;;  %386 = vset.pattern.permute.xlu1 %v391_v0  ;;  %v36_v41 = vrot.slane %v547_v35, %v35_v33  ;;  %v40_v42 = vrot.slane %v552_v36, %v35_v33  ;;  %v50_v43 = vrot.slane %v547_v35, %v49_v34  ;;  %v271_v33 = vld [vmem:[%s694_s4 + $0x98] sm:$0xff] }
   0xc   :  { %146 = vmatpush1.msra.mxu0 %v115_v9  ;;  %v54_v44 = vrot.slane %v552_v36, %v49_v34  ;;  %v66_v45 = vrot.slane %v547_v35, %v65_v37  ;;  %v70_v46 = vrot.slane %v552_v36, %v65_v37  ;;  %v82_v47 = vrot.slane %v547_v35, %v81_v40  ;;  %v267_v9 = vld [vmem:[%s694_s4 + $0x78] sm:$0xff]  ;;  %v270_v37 = vld [vmem:[%s694_s4 + $0x90] sm:$0xff] }
   0xd   :  { %147 = vmatprep.subr.mxu0 %v393_v4  ;;  %v86_v48 = vrot.slane %v552_v36, %v81_v40  ;;  %v98_v0 = vrot.slane %v552_v36, %v93_v51  ;;  %v94_v1 = vrot.slane %v547_v35, %v93_v51  ;;  %288 = vmatpush1.msra.mxu1 %v267_v9  ;;  %v268_v40 = vld [vmem:[%s694_s4 + $0x80] sm:$0xff] }
   0xe   :  { %148 = vmatpush1.msra.mxu0 %v114_v10  ;;  %v266_v10 = vld [vmem:[%s694_s4 + $0x70] sm:$0xff]  ;;  %289 = vmatprep.subr.mxu1 %v393_v4 }
   0xf   :  { %149 = vmatprep.subr.mxu0 %v393_v4  ;;  %290 = vmatpush1.msra.mxu1 %v266_v10 }
  0x10   :  { %150 = vmatpush1.msra.mxu0 %v113_v11  ;;  %v265_v11 = vld [vmem:[%s694_s4 + $0x68] sm:$0xff]  ;;  %291 = vmatprep.subr.mxu1 %v393_v4 }
  0x11   :  { %151 = vmatprep.subr.mxu0 %v393_v4  ;;  %292 = vmatpush1.msra.mxu1 %v265_v11 }
  0x12   :  { %152 = vmatpush1.msra.mxu0 %v112_v12  ;;  %v264_v12 = vld [vmem:[%s694_s4 + $0x60] sm:$0xff]  ;;  %293 = vmatprep.subr.mxu1 %v393_v4 }
  0x13   :  { %153 = vmatprep.subr.mxu0 %v393_v4  ;;  %294 = vmatpush1.msra.mxu1 %v264_v12 }
  0x14   :  { %154 = vmatpush1.msra.mxu0 %v111_v13  ;;  %v263_v13 = vld [vmem:[%s694_s4 + $0x58] sm:$0xff]  ;;  %295 = vmatprep.subr.mxu1 %v393_v4 }
  0x15   :  { %155 = vmatprep.subr.mxu0 %v393_v4  ;;  %296 = vmatpush1.msra.mxu1 %v263_v13 }
  0x16   :  { %156 = vmatpush1.msra.mxu0 %v110_v14  ;;  %v262_v14 = vld [vmem:[%s694_s4 + $0x50] sm:$0xff]  ;;  %297 = vmatprep.subr.mxu1 %v393_v4 }
  0x17   :  { %157 = vmatprep.subr.mxu0 %v393_v4  ;;  %298 = vmatpush1.msra.mxu1 %v262_v14 }
  0x18   :  { %158 = vmatpush1.msra.mxu0 %v109_v15  ;;  %v261_v15 = vld [vmem:[%s694_s4 + $0x48] sm:$0xff]  ;;  %299 = vmatprep.subr.mxu1 %v393_v4 }
  0x19   :  { %159 = vmatprep.subr.mxu0 %v393_v4  ;;  %300 = vmatpush1.msra.mxu1 %v261_v15 }
  0x1a   :  { %160 = vmatpush1.msra.mxu0 %v108_v16  ;;  %v260_v16 = vld [vmem:[%s694_s4 + $0x40] sm:$0xff]  ;;  %301 = vmatprep.subr.mxu1 %v393_v4 }
  0x1b   :  { %161 = vmatprep.subr.mxu0 %v393_v4  ;;  %302 = vmatpush1.msra.mxu1 %v260_v16 }
  0x1c   :  { %162 = vmatpush1.msra.mxu0 %v107_v17  ;;  %v259_v17 = vld [vmem:[%s694_s4 + $0x38] sm:$0xff]  ;;  %303 = vmatprep.subr.mxu1 %v393_v4 }
  0x1d   :  { %163 = vmatprep.subr.mxu0 %v393_v4  ;;  %304 = vmatpush1.msra.mxu1 %v259_v17 }
  0x1e   :  { %164 = vmatpush1.msra.mxu0 %v106_v18  ;;  %v258_v18 = vld [vmem:[%s694_s4 + $0x30] sm:$0xff]  ;;  %305 = vmatprep.subr.mxu1 %v393_v4 }
  0x1f   :  { %165 = vmatprep.subr.mxu0 %v393_v4  ;;  %306 = vmatpush1.msra.mxu1 %v258_v18 }
  0x20   :  { %166 = vmatpush1.msra.mxu0 %v105_v19  ;;  %v257_v19 = vld [vmem:[%s694_s4 + $0x28] sm:$0xff]  ;;  %307 = vmatprep.subr.mxu1 %v393_v4 }
  0x21   :  { %167 = vmatprep.subr.mxu0 %v393_v4  ;;  %308 = vmatpush1.msra.mxu1 %v257_v19 }
  0x22   :  { %168 = vmatpush1.msra.mxu0 %v104_v20  ;;  %v256_v20 = vld [vmem:[%s694_s4 + $0x20] sm:$0xff]  ;;  %309 = vmatprep.subr.mxu1 %v393_v4 }
  0x23   :  { %169 = vmatprep.subr.mxu0 %v393_v4  ;;  %310 = vmatpush1.msra.mxu1 %v256_v20 }
  0x24   :  { %170 = vmatpush1.msra.mxu0 %v103_v21  ;;  %v255_v21 = vld [vmem:[%s694_s4 + $0x18] sm:$0xff]  ;;  %311 = vmatprep.subr.mxu1 %v393_v4 }
  0x25   :  { %185 = vmatprep.subr.mxu0 %v393_v4  ;;  %312 = vmatpush1.msra.mxu1 %v255_v21 }
  0x26   :  { %186 = vmatpush2.msra.mxu0 %v127_v22  ;;  %v254_v22 = vld [vmem:[%s694_s4 + $0x10] sm:$0xff]  ;;  %313 = vmatprep.subr.mxu1 %v393_v4 }
  0x27   :  { %187 = vmatprep.subr.mxu0 %v393_v4  ;;  %314 = vmatpush1.msra.mxu1 %v254_v22 }
  0x28   :  { %188 = vmatpush2.msra.mxu0 %v126_v23  ;;  %v253_v23 = vld [vmem:[%s694_s4 + $0x8] sm:$0xff]  ;;  %315 = vmatprep.subr.mxu1 %v393_v4 }
  0x29   :  { %189 = vmatprep.subr.mxu0 %v393_v4  ;;  %316 = vmatpush1.msra.mxu1 %v253_v23 }
  0x2a   :  { %190 = vmatpush2.msra.mxu0 %v125_v24  ;;  %v252_v24 = vld [vmem:[%s694_s4] sm:$0xff]  ;;  %317 = vmatprep.subr.mxu1 %v393_v4 }
  0x2b   :  { %191 = vmatprep.subr.mxu0 %v393_v4  ;;  %318 = vmatpush1.msra.mxu1 %v252_v24 }
  0x2c   :  { %192 = vmatpush2.msra.mxu0 %v124_v25  ;;  %v276_v25 = vld [vmem:[%s694_s4 + $0xc0] sm:$0xff]  ;;  %333 = vmatprep.subr.mxu1 %v393_v4 }
  0x2d   :  { %193 = vmatprep.subr.mxu0 %v393_v4  ;;  %334 = vmatpush2.msra.mxu1 %v276_v25 }
  0x2e   :  { %194 = vmatpush2.msra.mxu0 %v123_v26  ;;  %v275_v26 = vld [vmem:[%s694_s4 + $0xb8] sm:$0xff]  ;;  %335 = vmatprep.subr.mxu1 %v393_v4 }
  0x2f   :  { %195 = vmatprep.subr.mxu0 %v393_v4  ;;  %336 = vmatpush2.msra.mxu1 %v275_v26 }
  0x30   :  { %196 = vmatpush2.msra.mxu0 %v122_v27  ;;  %v274_v27 = vld [vmem:[%s694_s4 + $0xb0] sm:$0xff]  ;;  %337 = vmatprep.subr.mxu1 %v393_v4 }
  0x31   :  { %197 = vmatprep.subr.mxu0 %v393_v4  ;;  %338 = vmatpush2.msra.mxu1 %v274_v27 }
  0x32   :  { %198 = vmatpush2.msra.mxu0 %v121_v28  ;;  %v273_v28 = vld [vmem:[%s694_s4 + $0xa8] sm:$0xff]  ;;  %339 = vmatprep.subr.mxu1 %v393_v4 }
  0x33   :  { %199 = vmatprep.subr.mxu0 %v393_v4  ;;  %340 = vmatpush2.msra.mxu1 %v273_v28 }
  0x34   :  { %200 = vmatpush2.msra.mxu0 %v120_v29  ;;  %341 = vmatprep.subr.mxu1 %v393_v4  ;;  %v373_v29 = vld [vmem:[%s695_s3] ss:$0 sm:$0xff] }
  0x35   :  { %201 = vmatprep.subr.mxu0 %v393_v4 }
  0x36   :  { %202 = vmatpush2.msra.mxu0 %v119_v30  ;;  %v272_v30 = vld [vmem:[%s694_s4 + $0xa0] sm:$0xff] }
  0x37   :  { %342 = vmatpush2.msra.mxu1 %v272_v30 }
  0x38   :  { %343 = vmatprep.subr.mxu1 %v393_v4 }
  0x39   :  { %344 = vmatpush2.msra.mxu1 %v271_v33 }
  0x3a   :  { %345 = vmatprep.subr.mxu1 %v393_v4 }
  0x3b   :  { %346 = vmatpush2.msra.mxu1 %v270_v37 }
  0x3c   :  { %347 = vmatprep.subr.mxu1 %v393_v4 }
  0x7d   :  { %v31_v38 = vpop.permute.xlu0 %30  ;;  %v61_v39 = vpop.permute.xlu1 %60 }
  0x7e   :  { %v41_v52 = vmul.f32 %v36_v41, %v31_v38  ;;  %v42_v53 = vmul.f32 %v40_v42, %v31_v38  ;;  %v71_v56 = vmul.f32 %v66_v45, %v61_v39  ;;  %v72_v57 = vmul.f32 %v70_v46, %v61_v39  ;;  %v269_v39 = vld [vmem:[%s694_s4 + $0x88] sm:$0xff] }
  0x7f   :  { %348 = vmatpush2.msra.mxu1 %v269_v39  ;;  %v230_v41 = vsub.s32 5, %v540_v32  ;;  %v216_v42 = vsub.s32 4, %v540_v32 }
  0x80   :  { %349 = vmatprep.subr.mxu1 %v393_v4 }
  0x81   :  { %350 = vmatpush2.msra.mxu1 %v268_v40  ;;  %v235_v45 = vrot.slane %v552_v36, %v230_v41  ;;  %v217_v46 = vrot.slane %v547_v35, %v216_v42 }
  0x82   :  { %v45_v49 = vpop.permute.xlu0 %44  ;;  %v77_v50 = vpop.permute.xlu1 %76 }
  0x83   :  { %v55_v54 = vmul.f32 %v50_v43, %v45_v49  ;;  %v56_v55 = vmul.f32 %v54_v44, %v45_v49  ;;  %v87_v60 = vmul.f32 %v82_v47, %v77_v50  ;;  %v88_v61 = vmul.f32 %v86_v48, %v77_v50 }
  0x84   :  { %v242_v43 = vsub.s32 7, %v540_v32  ;;  %v231_v44 = vrot.slane %v547_v35, %v230_v41  ;;  %v221_v47 = vrot.slane %v552_v36, %v216_v42 }
  0x85   :  { %v57_v58 = vadd.f32 %v55_v54, %v41_v52  ;;  %v58_v59 = vadd.f32 %v56_v55, %v42_v53 }
  0x86   :  { %v247_v50 = vrot.slane %v552_v36, %v242_v43  ;;  %v243_v4 = vrot.slane %v547_v35, %v242_v43 }
  0x87   :  { %v73_v62 = vadd.f32 %v71_v56, %v57_v58  ;;  %v74_v63 = vadd.f32 %v72_v57, %v58_v59 }
  0x89   :  { %v89_v2 = vadd.f32 %v87_v60, %v73_v62  ;;  %v90_v3 = vadd.f32 %v88_v61, %v74_v63  ;;  %v375_v60 = vld [vmem:[%s697_s5] ss:$0 sm:$0xff] }
  0x8b   :  { %v100_v5 = vadd.f32 %v98_v0, %v90_v3  ;;  %v99_v6 = vadd.f32 %v94_v1, %v89_v2 }
  0x8d   :  { %v102_v7 = vmax.f32 %v100_v5, 0.0  ;;  %v101_v8 = vmax.f32 %v99_v6, 0.0 }
  0x8f   :  { %374 = vmatprep.mubr.msk.f32.mxu0 %vm135_vm0, %v102_v7 }
  0x90   :  { %204 = vmatmul.mubr.f32.vlgmr.msra.gmra.mxu0 %v101_v8 }
 0x150   :  { %v205_v31 = vpop.f32.mrf.mxu0 }
 0x151   :  { %v206_v34 = vadd.f32 %v373_v29, %v205_v31 }
 0x152   :  { %v207_v38 = vpop.f32.mrf.mxu0 }
 0x153   :  { %364 = vst.msk [vmem:[%s696_s7] sm:$0xff] %vm362_vm1, %v206_v34  ;;  %225 = vperm.xlu0 %383, %v206_v34   ;;  %211 = vperm.xlu1 %386, %v206_v34  }
 0x1ce   :  { %v226_v48 = vpop.permute.xlu0 %225  ;;  %v212_v49 = vpop.permute.xlu1 %211 }
 0x1cf   :  { %v236_v51 = vmul.f32 %v231_v44, %v226_v48  ;;  %v237_v52 = vmul.f32 %v235_v45, %v226_v48  ;;  %v222_v53 = vmul.f32 %v217_v46, %v212_v49  ;;  %v223_v54 = vmul.f32 %v221_v47, %v212_v49 }
 0x1d1   :  { %v238_v55 = vadd.f32 %v236_v51, %v222_v53  ;;  %v239_v32 = vadd.f32 %v237_v52, %v223_v54 }
 0x1d3   :  { %v249_v56 = vadd.f32 %v247_v50, %v239_v32  ;;  %v248_v57 = vadd.f32 %v243_v4, %v238_v55 }
 0x1d5   :  { %v251_v58 = vmax.f32 %v249_v56, 0.0  ;;  %v250_v59 = vmax.f32 %v248_v57, 0.0 }
 0x1d7   :  { %376 = vmatprep.mubr.msk.f32.mxu1 %vm135_vm0, %v251_v58 }
 0x1d8   :  { %352 = vmatmul.mubr.f32.vlgmr.msra.gmra.mxu1 %v250_v59 }
 0x298   :  { %v353_v36 = vpop.f32.mrf.mxu1 }
 0x299   :  { %v354_v61 = vadd.f32 %v375_v60, %v353_v36 }
 0x29a   :  { %v355_v35 = vpop.f32.mrf.mxu1 }
 0x29b   :  { %v357_v62 = vsub.f32 0.0, %v354_v61 }
 0x29d   :  { %v358_v63 = vmul.f32 1.442695, %v357_v62 }
 0x29f   :  { %387 = vpow2.f32 %v358_v63 }
 0x2ac   :  { %v388_v0 = vpop.eup %387 }
 0x2ad   :  { %v360_v1 = vadd.f32 1.0, %v388_v0 }
 0x2af   :  { %389 = vrcp.f32 %v360_v1 }
 0x2bc   :  { %v390_v2 = vpop.eup %389 }
 0x2bd   :  { %363 = vst.msk [vmem:[%s698_s6] sm:$0xff] %vm362_vm1, %v390_v2 }

</bundles_post_ra>
